<compile_context>
chip_gen: v6e
topology: v6e:2x2x1
jax: 0.10.0
libtpu: 0.0.40
codegen_flags: <defaults>
</compile_context>

<pallas_src>
import jax
import jax.numpy as jnp
from jax.experimental import pallas as pl
from jax.experimental.pallas import tpu as pltpu


def _round_up(x: int, m: int) -> int:
    return ((x + m - 1) // m) * m


def update_kernel(h_ref, c_ref, w_ref, b_ref, o_ref):
    d_in = h_ref.shape[1]
    # Linear on the concatenation: cat([h, c]) @ W + b == h @ W[:D_in] + c @ W[D_in:] + b
    y = jnp.dot(h_ref[...], w_ref[:d_in, :], preferred_element_type=jnp.float32)
    y += jnp.dot(c_ref[...], w_ref[d_in:, :], preferred_element_type=jnp.float32)
    y += b_ref[...]                                   # (tm, Dp) + (1, Dp), f32
    # F.normalize(p=2, dim=1): x / max(||x||, 1e-12) == x * rsqrt(max(||x||^2, 1e-24)).
    # Zero-padded output columns contribute exactly 0 to the row sum of squares.
    ss = jnp.sum(y * y, axis=1, keepdims=True)
    y *= jax.lax.rsqrt(jnp.maximum(ss, 1e-24))        # rsqrt -> EUP slot (cheap)
    y = jnp.maximum(y, 0.0)                           # activation = ReLU
    o_ref[...] = y.astype(o_ref.dtype)


def update_module_forward(h, c, W, b, *, tm=512,
                          io_dtype=jnp.bfloat16, out_dtype=None):
    """UpdateModule apply step.  h, c: [N, D_in]; W: [2*D_in, D_out]; b: [D_out]."""
    N, D_in = h.shape
    assert c.shape == (N, D_in)
    two_din, D_out = W.shape
    assert two_din == 2 * D_in and b.shape == (D_out,)
    out_dtype = io_dtype if out_dtype is None else out_dtype

    # --- lane-dense output: pad D_out up to a multiple of 128 with zero columns ---
    D_pad = _round_up(D_out, 128)
    if D_pad != D_out:
        W = jnp.pad(W, ((0, 0), (0, D_pad - D_out)))
        b = jnp.pad(b, (0, D_pad - D_out))

    # --- bf16 I/O (mem-bound); bias stays f32 (added to the f32 accumulator) ---
    h = h.astype(io_dtype)
    c = c.astype(io_dtype)
    W = W.astype(io_dtype)
    b2 = b.reshape(1, D_pad).astype(jnp.float32)

    io_bytes = jnp.dtype(io_dtype).itemsize
    out_bytes = jnp.dtype(out_dtype).itemsize

    # --- explicit VMEM budget: headroom inside v7x's 64 MiB physical VMEM ---
    VMEM_BUDGET = 48 << 20
    resident = 2 * D_in * D_pad * io_bytes + D_pad * 4       # W + bias (single-buffered)
    per_row = (2 * (2 * D_in * io_bytes)       # h + c tiles, double-buffered
               + 2 * (D_pad * out_bytes)       # output tile, double-buffered
               + D_pad * 4)                    # f32 intermediate y (worst case in VMEM)
    max_tm = max(8, ((VMEM_BUDGET - resident) // per_row) // 8 * 8)

    # Row tile: as large as the budget allows (amortize ~0.35 us/grid-step, approach
    # HBM roofline), but keep >=2 grid steps so "parallel" can shard rows across
    # v7x's 2 TensorCores.
    tm_eff = max(8, min(tm, _round_up(N, 8), max_tm))
    if pl.cdiv(N, tm_eff) < 2 and N > 8:
        tm_eff = _round_up(pl.cdiv(N, 2), 8)

    need = resident + tm_eff * per_row
    vmem_limit = int(min(48 << 20, max(32 << 20, int(1.25 * need))))

    grid = (pl.cdiv(N, tm_eff),)
    out_padded = pl.pallas_call(
        update_kernel,
        out_shape=jax.ShapeDtypeStruct((N, D_pad), out_dtype),
        grid_spec=pltpu.PrefetchScalarGridSpec(
            num_scalar_prefetch=0,
            grid=grid,
            in_specs=[
                pl.BlockSpec((tm_eff, D_in), lambda i: (i, 0)),      # h row tile
                pl.BlockSpec((tm_eff, D_in), lambda i: (i, 0)),      # c row tile
                pl.BlockSpec((2 * D_in, D_pad), lambda i: (0, 0)),   # W (resident)
                pl.BlockSpec((1, D_pad), lambda i: (0, 0)),          # bias (resident)
            ],
            out_specs=pl.BlockSpec((tm_eff, D_pad), lambda i: (i, 0)),
        ),
        compiler_params=pltpu.CompilerParams(
            dimension_semantics=("parallel",),
            vmem_limit_bytes=vmem_limit,
        ),
    )(h, c, W, b2)
    # TODO(synk): if profiling shows exposed DMA for very small D_in, bump the h/c
    # specs to pipeline_mode=pl.Buffered(3) (costs one extra tile of VMEM).
    return out_padded[:, :D_out]


def update_module_reference(h, c, W, b):
    bundle = jnp.concatenate([h, c], axis=1) @ W + b
    norm = jnp.sqrt(jnp.sum(bundle * bundle, axis=1, keepdims=True))
    bundle = bundle / jnp.maximum(norm, 1e-12)
    return jnp.maximum(bundle, 0.0)


if __name__ == "__main__":
    key = jax.random.PRNGKey(0)
    k_h, k_c, k_w, k_b = jax.random.split(key, 4)

    # Small shapes consistent with the module: N nodes, node-feature dim D_in,
    # apply_func = nn.Linear(2*D_in, D_out).
    N, D_in, D_out = 256, 32, 32

    h = jax.random.normal(k_h, (N, D_in), dtype=jnp.float32)
    c = jax.random.normal(k_c, (N, D_in), dtype=jnp.float32)
    limit = 1.0 / jnp.sqrt(2.0 * D_in)
    W = jax.random.uniform(k_w, (2 * D_in, D_out), jnp.float32, -limit, limit)
    b = jax.random.uniform(k_b, (D_out,), jnp.float32, -limit, limit)

    ref = update_module_reference(h, c, W, b)

    # 1) exact-precision path (f32 I/O) -> tight check against the JAX reference.
    out_f32 = update_module_forward(h, c, W, b,
                                    io_dtype=jnp.float32, out_dtype=jnp.float32)
    out_f32 = jax.block_until_ready(out_f32)
    assert out_f32.shape == (N, D_out)
    assert jnp.allclose(out_f32, ref, atol=1e-4, rtol=1e-4), "f32 mismatch vs reference"

    # 2) performance path (bf16 I/O + bf16 output, f32 accumulation) -> loose check.
    out_bf16 = update_module_forward(h, c, W, b)          # defaults: tm=512, bf16
    out_bf16 = jax.block_until_ready(out_bf16)
    assert out_bf16.shape == (N, D_out)
    assert jnp.allclose(out_bf16.astype(jnp.float32), ref, atol=3e-2, rtol=0.0), \
        "bf16 mismatch vs reference"

    print("KERNEL_OK")
</pallas_src>

<mosaic_0001>
module attributes {stable_mosaic.version = 11 : i64} {
  func.func @update_kernel(%arg0: i32, %arg1: memref<128x32xf32, #tpu.memory_space<vmem>>, %arg2: memref<128x32xf32, #tpu.memory_space<vmem>>, %arg3: memref<64x128xf32, #tpu.memory_space<vmem>>, %arg4: memref<1x128xf32, #tpu.memory_space<vmem>>, %arg5: memref<128x128xf32, #tpu.memory_space<vmem>>) attributes {dimension_semantics = [#tpu.dimension_semantics<parallel>], iteration_bounds = array<i64: 2>, scalar_prefetch = 0 : i64, scratch_operands = 0 : i64, tpu.core_type = #tpu.core_type<tc>, window_params = [{transform_indices = @transform_0, window_bounds = array<i64: 128, 32>}, {transform_indices = @transform_1, window_bounds = array<i64: 128, 32>}, {pipeline_mode = #tpu.pipeline_mode<synchronous>, transform_indices = @transform_2, window_bounds = array<i64: 64, 128>}, {pipeline_mode = #tpu.pipeline_mode<synchronous>, transform_indices = @transform_3, window_bounds = array<i64: 1, 128>}, {transform_indices = @transform_4, window_bounds = array<i64: 128, 128>}]} {
    %c0 = arith.constant 0 : index
    %c0_0 = arith.constant 0 : index
    %0 = vector.load %arg1[%c0, %c0_0] : memref<128x32xf32, #tpu.memory_space<vmem>>, vector<128x32xf32>
    %c0_1 = arith.constant 0 : index
    %c0_2 = arith.constant 0 : index
    %1 = vector.load %arg3[%c0_1, %c0_2] : memref<64x128xf32, #tpu.memory_space<vmem>>, vector<32x128xf32>
    %cst = arith.constant dense<0.000000e+00> : vector<128x128xf32>
    %2 = tpu.matmul %0, %1, %cst {dimension_numbers = #tpu.dot_dimension_numbers<[1], [0], [0], [1], [0, 0, 1, 1], [], []>} : vector<128x32xf32>, vector<32x128xf32>, vector<128x128xf32> -> vector<128x128xf32>
    %c0_3 = arith.constant 0 : index
    %c0_4 = arith.constant 0 : index
    %3 = vector.load %arg2[%c0_3, %c0_4] : memref<128x32xf32, #tpu.memory_space<vmem>>, vector<128x32xf32>
    %c32 = arith.constant 32 : index
    %c0_5 = arith.constant 0 : index
    %4 = vector.load %arg3[%c32, %c0_5] : memref<64x128xf32, #tpu.memory_space<vmem>>, vector<32x128xf32>
    %cst_6 = arith.constant dense<0.000000e+00> : vector<128x128xf32>
    %5 = tpu.matmul %3, %4, %cst_6 {dimension_numbers = #tpu.dot_dimension_numbers<[1], [0], [0], [1], [0, 0, 1, 1], [], []>} : vector<128x32xf32>, vector<32x128xf32>, vector<128x128xf32> -> vector<128x128xf32>
    %6 = arith.addf %2, %5 : vector<128x128xf32>
    %c0_7 = arith.constant 0 : index
    %c0_8 = arith.constant 0 : index
    %7 = vector.load %arg4[%c0_7, %c0_8] : memref<1x128xf32, #tpu.memory_space<vmem>>, vector<1x128xf32>
    %8 = vector.broadcast %7 : vector<1x128xf32> to vector<128x128xf32>
    %9 = arith.addf %6, %8 : vector<128x128xf32>
    %10 = arith.mulf %9, %9 : vector<128x128xf32>
    %cst_9 = arith.constant dense<0.000000e+00> : vector<128xf32>
    %11 = vector.multi_reduction <add>, %10, %cst_9 [1] : vector<128x128xf32> to vector<128xf32>
    %12 = vector.shape_cast %11 : vector<128xf32> to vector<128x1xf32>
    %cst_10 = arith.constant 1.000000e-24 : f32
    %13 = vector.broadcast %cst_10 : f32 to vector<128x1xf32>
    %14 = arith.maximumf %12, %13 : vector<128x1xf32>
    %15 = math.rsqrt %14 : vector<128x1xf32>
    %16 = vector.broadcast %15 : vector<128x1xf32> to vector<128x128xf32>
    %17 = arith.mulf %9, %16 : vector<128x128xf32>
    %cst_11 = arith.constant 0.000000e+00 : f32
    %18 = vector.broadcast %cst_11 : f32 to vector<128x128xf32>
    %19 = arith.maximumf %17, %18 : vector<128x128xf32>
    %c0_12 = arith.constant 0 : index
    %c0_13 = arith.constant 0 : index
    %20 = vector.load %arg5[%c0_12, %c0_13] : memref<128x128xf32, #tpu.memory_space<vmem>>, vector<128x128xf32>
    tpu.vector_store %arg5[%c0_12, %c0_13], %19 {strides = array<i32>} : memref<128x128xf32, #tpu.memory_space<vmem>>, vector<128x128xf32>,
    return
  }
  func.func @transform_0(%arg0: i32) -> (i32, i32) {
    %c0_i32 = arith.constant 0 : i32
    %c0_i32_0 = arith.constant 0 : i32
    return %arg0, %c0_i32 : i32, i32
  }
  func.func @transform_1(%arg0: i32) -> (i32, i32) {
    %c0_i32 = arith.constant 0 : i32
    %c0_i32_0 = arith.constant 0 : i32
    return %arg0, %c0_i32 : i32, i32
  }
  func.func @transform_2(%arg0: i32) -> (i32, i32) {
    %c0_i32 = arith.constant 0 : i32
    %c0_i32_0 = arith.constant 0 : i32
    %c0_i32_1 = arith.constant 0 : i32
    return %c0_i32, %c0_i32_0 : i32, i32
  }
  func.func @transform_3(%arg0: i32) -> (i32, i32) {
    %c0_i32 = arith.constant 0 : i32
    %c0_i32_0 = arith.constant 0 : i32
    %c0_i32_1 = arith.constant 0 : i32
    return %c0_i32, %c0_i32_0 : i32, i32
  }
  func.func @transform_4(%arg0: i32) -> (i32, i32) {
    %c0_i32 = arith.constant 0 : i32
    %c0_i32_0 = arith.constant 0 : i32
    return %arg0, %c0_i32 : i32, i32
  }
}

</mosaic_0001>

<bundles_post_ra>
// kernel: tpu_custom_call.1
= control target key start
LH: loop header
LB: loop body
LE: loop exit
PB: predicated region body
PF: predicated region fallthrough
CT: control target
= control target key end

     0   :  { %9 = vsyncpa [#allocation3], 0  ;;  %s1522_s0 = inlined_call_operand.vmem [shape: f32[256,32], index: 0, kind: input, shape index: {}]   ;;  %s1523_s1 = inlined_call_operand.vmem [shape: f32[256,32], index: 1, kind: input, shape index: {}]   ;;  %s1524_s2 = inlined_call_operand.vmem [shape: f32[64,128], index: 2, kind: input, shape index: {}]   ;;  %s1525_s3 = inlined_call_operand.vmem [shape: f32[1,128], index: 3, kind: input, shape index: {}]   ;;  %s1526_s4 = inlined_call_operand.hbm [shape: f32[256,128], index: 4, kind: output, shape index: {}]  }
   0x1   :  { %11 = vsyncpa [#allocation3 + $0x1], 0  ;;  %s1202_s15 = smov 0   ;;  %s1204_s16 = smov 0  }
   0x2   :  { %s1206_s17 = smov 0   ;;  %s1208_s18 = smov 0  }
   0x3 LB: > { %s1223_s19 = sadd.s32 4294967295, %s1172_s18   ;;  %s887_s20 = sadd.s32 4294967294, %s1172_s18   ;;  %s1172_s18 = sphi %s1208_s18, %s1532_s18   ;;  %s1168_s17 = sphi %s1206_s17, %s1531_s17   ;;  %s1164_s16 = sphi %s1204_s16, %s1530_s16   ;;  %s1160_s15 = sphi %s1202_s15, %s1529_s15  }
   0x4   : > { %s1227_s21 = sadd.s32 1, %s1172_s18   ;;  %s118_s22 = sadd.s32 1, %s1168_s17 }
   0x5   : > { %s115_s23 = ssub.s32 %s1172_s18, %s1227_s21  ;;  %p128_p0 = scmp.ne.s32.totalorder %s1168_s17, %s1164_s16 }
   0x6   : > { %p116_p1 = scmp.eq.s32.totalorder %s115_s23, 0  ;;  %p129_p2 = scmp.eq.s32.totalorder %s1223_s19, 1 }
   0x7   : > { %p134_p3 = scmp.ne.s32.totalorder %s1164_s16, %s1160_s15  ;;  %p135_p4 = scmp.eq.s32.totalorder %s887_s20, 1 }
   0x8   : > { %s1238_s24 = scalar_select %p116_p1, %s1168_s17, %s118_s22  }
   0x9   : > { %p1240_p5 = por %p129_p2, %p128_p0  ;;  %p1244_p6 = por %p135_p4, %p134_p3 }
   0xa   : > { %p890_p7 = scmp.ge.s32.totalorder %s1172_s18, 1  ;;  %p177_p8 = scmp.lt.s32.totalorder %s1172_s18, 3 }
   0xc   : > { %p178_p9 = pnand %p890_p7, %p177_p8 }
   0xd   : > { %s892_s7 = sshll.u32 (!%p178_p9), %s1223_s19, 4  ;;  %s205_s10 = sand.u32 (!%p178_p9), 1, %s1164_s16  }
   0xe   : > { %181 = sbr.rel (%p178_p9) target bundleno = 433 (0x1b1), region = 36  ;;  %p209_p10 = scmp.lt.s32.totalorder (!%p178_p9), %s892_s7, 31 }
   0xf   : > { %s891_s11 = sshll.u32 (!%p178_p9), %s205_s10, 7  ;;  %s934_s13 = sshll.u32 (!%p178_p9), %s1223_s19, 11 }
  0x10   : > { %s1438_s12 = scalar_lea.vmem (!%p178_p9), [#allocation2], %s891_s11  ;;  %s1474_s23 = scalar_lea.hbm (!%p178_p9), %s1526_s4, %s934_s13 }
  0x11   : > { %s813_s14 = sshll.u32 (!%p178_p9), %s1438_s12, 4  ;;  %s1482_s19 = scalar_lea.sflag (!%p178_p9), [#allocation3], %s205_s10  ;;  %s1476_s14 = int_to_ptr.vmem [resolvable:$true] %s813_s14 }
  0x12   : > { %s1174_s28 = smov (!%p178_p9), [#allocation2]  }
  0x13   : > { %v260_v0 = vld [vmem:[%s1524_s2 + $0x38] sm:$0xff]  ;;  %v259_v2 = vld [vmem:[%s1524_s2 + $0x30] sm:$0xff]  ;;  %v258_v4 = vld [vmem:[%s1524_s2 + $0x28] sm:$0xff]  ;;  %s1534_s7 = smov (!%p209_p10, %s892_s7), 31  ;;  %vm261_vm0 = vcmask 261120   ;;  %s1116_s29 = sshll.u32 %s1174_s28, 4  ;;  %s1117_s29 = int_to_ptr.vmem [resolvable:$false] %s1116_s29 }
  0x14   : > { %v240_v1 = vld [vmem:[%s1524_s2 + $0x18] sm:$0xff]  ;;  %975 = vmatprep.subr.mxu0 %v260_v0  ;;  %v239_v3 = vld [vmem:[%s1524_s2 + $0x10] sm:$0xff]  ;;  %v238_v5 = vld [vmem:[%s1524_s2 + $0x8] sm:$0xff]  ;;  %s893_s27 = sshll.u32 %s1534_s7, 3  ;;  %p1119_p0 = scmp.lt.s32.totalorder %s1476_s14, %s1117_s29 }
  0x15   : > { %1007 = vmatprep.subr.mxu1 %v240_v1  ;;  %976 = vmatpush3.msra.mxu0 %v260_v0  ;;  %v257_v6 = vld [vmem:[%s1524_s2 + $0x20] sm:$0xff]  ;;  %s1278_s30 = scalar_lea.vmem %s1523_s1, %s893_s27  ;;  %s1283_s8 = scalar_lea.vmem %s1522_s0, %s893_s27 }
  0x16   : > { %1008 = vmatpush3.msra.mxu1 %v240_v1  ;;  %977 = vmatprep.subr.mxu0 %v259_v2  ;;  %v237_v7 = vld [vmem:[%s1524_s2] sm:$0xff]  ;;  %v242_v10 = vld [vmem:[%s1278_s30 + $0x8] sm:$0xff]  ;;  %v243_v12 = vld [vmem:[%s1278_s30 + $0x10] sm:$0xff]  ;;  %s1112_s27 = scalar_lea.vmem %s1476_s14, 2048 }
  0x17   : > { %1009 = vmatprep.subr.mxu1 %v239_v3  ;;  %978 = vmatpush3.msra.mxu0 %v259_v2  ;;  %v241_v8 = vld [vmem:[%s1278_s30] sm:$0xff]  ;;  %v222_v11 = vld [vmem:[%s1283_s8 + $0x8] sm:$0xff]  ;;  %v223_v13 = vld [vmem:[%s1283_s8 + $0x10] sm:$0xff]  ;;  %p1113_p11 = scmp.ne.s32.totalorder %s1476_s14, %s1112_s27 }
  0x18   : > { %1010 = vmatpush3.msra.mxu1 %v239_v3  ;;  %979 = vmatprep.subr.mxu0 %v258_v4  ;;  %v221_v9 = vld [vmem:[%s1283_s8] sm:$0xff]  ;;  %v244_v14 = vld [vmem:[%s1278_s30 + $0x18] sm:$0xff]  ;;  %v246_v18 = vld [vmem:[%s1278_s30 + $0x28] sm:$0xff] }
  0x19   : > { %1011 = vmatprep.subr.mxu1 %v238_v5  ;;  %980 = vmatpush3.msra.mxu0 %v258_v4  ;;  %v224_v15 = vld [vmem:[%s1283_s8 + $0x18] sm:$0xff]  ;;  %v245_v16 = vld [vmem:[%s1278_s30 + $0x20] sm:$0xff]  ;;  %v226_v19 = vld [vmem:[%s1283_s8 + $0x28] sm:$0xff]  ;;  %p1114_p12 = pnand %p1113_p11, %p1240_p5 }
  0x1a   : > { %1012 = vmatpush3.msra.mxu1 %v238_v5  ;;  %981 = vmatprep.subr.mxu0 %v257_v6  ;;  %v225_v17 = vld [vmem:[%s1283_s8 + $0x20] sm:$0xff]  ;;  %v247_v20 = vld [vmem:[%s1278_s30 + $0x30] sm:$0xff]  ;;  %v248_v22 = vld [vmem:[%s1278_s30 + $0x38] sm:$0xff] }
  0x1b   : > { %1013 = vmatprep.subr.mxu1 %v237_v7  ;;  %982 = vmatpush3.msra.mxu0 %v257_v6  ;;  %v227_v21 = vld [vmem:[%s1283_s8 + $0x30] sm:$0xff]  ;;  %v228_v23 = vld [vmem:[%s1283_s8 + $0x38] sm:$0xff]  ;;  %v249_v24 = vld [vmem:[%s1278_s30 + $0x40] sm:$0xff]  ;;  %p1115_p13 = pneg %p1114_p12 }
  0x1c   : > { %983 = vmatprep.mubr.msk.f32.mxu0 %vm261_vm0, %v241_v8  ;;  %1014 = vmatpush3.msra.mxu1 %v237_v7  ;;  %v229_v25 = vld [vmem:[%s1283_s8 + $0x40] sm:$0xff]  ;;  %v250_v26 = vld [vmem:[%s1278_s30 + $0x48] sm:$0xff]  ;;  %v251_v28 = vld [vmem:[%s1278_s30 + $0x50] sm:$0xff] }
  0x1d   : > { %1015 = vmatprep.mubr.msk.f32.mxu1 %vm261_vm0, %v221_v9  ;;  %984 = vmatmul.mubr.msk.f32.vlgmr.msra.gmra.mxu0 %vm261_vm0, %v242_v10  ;;  %v230_v27 = vld [vmem:[%s1283_s8 + $0x48] sm:$0xff]  ;;  %v231_v29 = vld [vmem:[%s1283_s8 + $0x50] sm:$0xff]  ;;  %v252_v30 = vld [vmem:[%s1278_s30 + $0x58] sm:$0xff] }
  0x1e   : > { %1016 = vmatmul.mubr.msk.f32.vlgmr.msra.gmra.mxu1 %vm261_vm0, %v222_v11  ;;  %986 = vmatprep.mubr.msk.f32.mxu0 %vm261_vm0, %v243_v12  ;;  %v232_v31 = vld [vmem:[%s1283_s8 + $0x58] sm:$0xff]  ;;  %v253_v32 = vld [vmem:[%s1278_s30 + $0x60] sm:$0xff]  ;;  %v254_v34 = vld [vmem:[%s1278_s30 + $0x68] sm:$0xff] }
  0x1f   : > { %1018 = vmatprep.mubr.msk.f32.mxu1 %vm261_vm0, %v223_v13  ;;  %v233_v33 = vld [vmem:[%s1283_s8 + $0x60] sm:$0xff]  ;;  %v234_v35 = vld [vmem:[%s1283_s8 + $0x68] sm:$0xff]  ;;  %v255_v36 = vld [vmem:[%s1278_s30 + $0x70] sm:$0xff] }
  0x20   : > { %v235_v37 = vld [vmem:[%s1283_s8 + $0x70] sm:$0xff]  ;;  %v256_v38 = vld [vmem:[%s1278_s30 + $0x78] sm:$0xff]  ;;  %v1352_v42 = vld [vmem:[%s1525_s3] ss:$0 sm:$0xff]  ;;  %s1118_s30 = scalar_lea.vmem %s1117_s29, 4096 }
  0x21   : > { %987 = vmatmul.mubr.msk.f32.gmra.mxu0 %vm261_vm0, %v244_v14  ;;  %v236_v39 = vld [vmem:[%s1283_s8 + $0x78] sm:$0xff]  ;;  %p1120_p1 = scmp.lt.s32.totalorder %s1118_s30, %s1112_s27 }
  0x22   : > { %1019 = vmatmul.mubr.msk.f32.gmra.mxu1 %vm261_vm0, %v224_v15  ;;  %989 = vmatprep.mubr.msk.f32.mxu0 %vm261_vm0, %v245_v16 }
  0x23   : > { %1021 = vmatprep.mubr.msk.f32.mxu1 %vm261_vm0, %v225_v17  ;;  %p1121_p2 = por %p1120_p1, %p1119_p0 }
  0x25   : > { %990 = vmatmul.mubr.msk.f32.gmra.mxu0 %vm261_vm0, %v246_v18  ;;  %p1122_p3 = pnand %p1121_p2, %p1115_p13 }
  0x26   : > { %1022 = vmatmul.mubr.msk.f32.gmra.mxu1 %vm261_vm0, %v226_v19  ;;  %992 = vmatprep.mubr.msk.f32.mxu0 %vm261_vm0, %v247_v20 }
  0x27   : > { %1024 = vmatprep.mubr.msk.f32.mxu1 %vm261_vm0, %v227_v21 }
  0x29   : > { %993 = vmatmul.mubr.msk.f32.gmra.mxu0 %vm261_vm0, %v248_v22 }
  0x2a   : > { %1025 = vmatmul.mubr.msk.f32.gmra.mxu1 %vm261_vm0, %v228_v23  ;;  %995 = vmatprep.mubr.msk.f32.mxu0 %vm261_vm0, %v249_v24 }
  0x2b   : > { %1027 = vmatprep.mubr.msk.f32.mxu1 %vm261_vm0, %v229_v25 }
  0x2d   : > { %996 = vmatmul.mubr.msk.f32.gmra.mxu0 %vm261_vm0, %v250_v26 }
  0x2e   : > { %1028 = vmatmul.mubr.msk.f32.gmra.mxu1 %vm261_vm0, %v230_v27  ;;  %998 = vmatprep.mubr.msk.f32.mxu0 %vm261_vm0, %v251_v28 }
  0x2f   : > { %1030 = vmatprep.mubr.msk.f32.mxu1 %vm261_vm0, %v231_v29 }
  0x31   : > { %999 = vmatmul.mubr.msk.f32.gmra.mxu0 %vm261_vm0, %v252_v30 }
  0x32   : > { %1031 = vmatmul.mubr.msk.f32.gmra.mxu1 %vm261_vm0, %v232_v31  ;;  %1001 = vmatprep.mubr.msk.f32.mxu0 %vm261_vm0, %v253_v32 }
  0x33   : > { %1033 = vmatprep.mubr.msk.f32.mxu1 %vm261_vm0, %v233_v33 }
  0x35   : > { %1002 = vmatmul.mubr.msk.f32.gmra.mxu0 %vm261_vm0, %v254_v34 }
  0x36   : > { %1034 = vmatmul.mubr.msk.f32.gmra.mxu1 %vm261_vm0, %v234_v35  ;;  %1004 = vmatprep.mubr.msk.f32.mxu0 %vm261_vm0, %v255_v36 }
  0x37   : > { %1036 = vmatprep.mubr.msk.f32.mxu1 %vm261_vm0, %v235_v37 }
  0x39   : > { %1005 = vmatmul.mubr.msk.f32.gmra.mxu0 %vm261_vm0, %v256_v38 }
  0x3a   : > { %1037 = vmatmul.mubr.msk.f32.gmra.mxu1 %vm261_vm0, %v236_v39 }
  0xdd   : > { %v985_v40 = vpop.f32.mrf.mxu0 }
  0xde   : > { %v1017_v41 = vpop.f32.mrf.mxu1 }
  0xdf   : > { %v575_v43 = vadd.f32 %v1017_v41, %v985_v40  ;;  %v376_v44 = vpop.f32.mrf.mxu0 }
  0xe0   : > { %v569_v45 = vpop.f32.mrf.mxu1 }
  0xe1   : > { %v570_v46 = vadd.f32 %v569_v45, %v376_v44  ;;  %v1355_v47 = vadd.f32 %v1352_v42, %v575_v43  ;;  %v988_v48 = vpop.f32.mrf.mxu0 }
  0xe2   : > { %v1020_v49 = vpop.f32.mrf.mxu1 }
  0xe3   : > { %v1358_v50 = vadd.f32 %v1352_v42, %v570_v46  ;;  %v585_v51 = vadd.f32 %v1020_v49, %v988_v48  ;;  %v672_v52 = vmul.f32 %v1355_v47, %v1355_v47  ;;  %v386_v53 = vpop.f32.mrf.mxu0 }
  0xe4   : > { %v579_v54 = vpop.f32.mrf.mxu1 }
  0xe5   : > { %v580_v55 = vadd.f32 %v579_v54, %v386_v53  ;;  %689 = vadd.xlane.f32.xlu0 %v672_v52  ;;  %v1363_v56 = vadd.f32 %v1352_v42, %v585_v51  ;;  %v991_v57 = vpop.f32.mrf.mxu0  ;;  %v671_v62 = vmul.f32 %v1358_v50, %v1358_v50 }
  0xe6   : > { %v1023_v58 = vpop.f32.mrf.mxu1 }
  0xe7   : > { %v1366_v59 = vadd.f32 %v1352_v42, %v580_v55  ;;  %v595_v60 = vadd.f32 %v1023_v58, %v991_v57  ;;  %v674_v61 = vmul.f32 %v1363_v56, %v1363_v56  ;;  %v396_v63 = vpop.f32.mrf.mxu0 }
  0xe8   : > { %v589_v0 = vpop.f32.mrf.mxu1 }
  0xe9   : > { %v590_v1 = vadd.f32 %v589_v0, %v396_v63  ;;  %693 = vadd.xlane.f32.xlu1 %v674_v61  ;;  %687 = vadd.xlane.f32.xlu0 %v671_v62  ;;  %v994_v2 = vpop.f32.mrf.mxu0  ;;  %v1373_v4 = vadd.f32 %v1352_v42, %v595_v60  ;;  %v673_v7 = vmul.f32 %v1366_v59, %v1366_v59 }
  0xea   : > { %v1026_v3 = vpop.f32.mrf.mxu1 }
  0xeb   : > { %v1376_v5 = vadd.f32 %v1352_v42, %v590_v1  ;;  %v605_v6 = vadd.f32 %v1026_v3, %v994_v2  ;;  %v406_v8 = vpop.f32.mrf.mxu0  ;;  %v676_v17 = vmul.f32 %v1373_v4, %v1373_v4 }
  0xec   : > { %v599_v9 = vpop.f32.mrf.mxu1 }
  0xed   : > { %v600_v10 = vadd.f32 %v599_v9, %v406_v8  ;;  %691 = vadd.xlane.f32.xlu1 %v673_v7  ;;  %v675_v11 = vmul.f32 %v1376_v5, %v1376_v5  ;;  %v997_v12 = vpop.f32.mrf.mxu0  ;;  %v1383_v14 = vadd.f32 %v1352_v42, %v605_v6 }
  0xee   : > { %v1029_v13 = vpop.f32.mrf.mxu1 }
  0xef   : > { %v1386_v15 = vadd.f32 %v1352_v42, %v600_v10  ;;  %v615_v16 = vadd.f32 %v1029_v13, %v997_v12  ;;  %695 = vadd.xlane.f32.xlu0 %v675_v11  ;;  %v416_v18 = vpop.f32.mrf.mxu0  ;;  %v678_v27 = vmul.f32 %v1383_v14, %v1383_v14 }
  0xf0   : > { %v609_v19 = vpop.f32.mrf.mxu1 }
  0xf1   : > { %v610_v20 = vadd.f32 %v609_v19, %v416_v18  ;;  %697 = vadd.xlane.f32.xlu1 %v676_v17  ;;  %v677_v21 = vmul.f32 %v1386_v15, %v1386_v15  ;;  %v1000_v22 = vpop.f32.mrf.mxu0  ;;  %v1393_v24 = vadd.f32 %v1352_v42, %v615_v16 }
  0xf2   : > { %v1032_v23 = vpop.f32.mrf.mxu1 }
  0xf3   : > { %v1396_v25 = vadd.f32 %v1352_v42, %v610_v20  ;;  %v625_v26 = vadd.f32 %v1032_v23, %v1000_v22  ;;  %699 = vadd.xlane.f32.xlu0 %v677_v21  ;;  %v426_v28 = vpop.f32.mrf.mxu0  ;;  %v680_v37 = vmul.f32 %v1393_v24, %v1393_v24 }
  0xf4   : > { %v619_v29 = vpop.f32.mrf.mxu1 }
  0xf5   : > { %v620_v30 = vadd.f32 %v619_v29, %v426_v28  ;;  %701 = vadd.xlane.f32.xlu1 %v678_v27  ;;  %v679_v31 = vmul.f32 %v1396_v25, %v1396_v25  ;;  %v1003_v32 = vpop.f32.mrf.mxu0  ;;  %v1403_v34 = vadd.f32 %v1352_v42, %v625_v26 }
  0xf6   : > { %v1035_v33 = vpop.f32.mrf.mxu1 }
  0xf7   : > { %v1406_v35 = vadd.f32 %v1352_v42, %v620_v30  ;;  %v635_v36 = vadd.f32 %v1035_v33, %v1003_v32  ;;  %703 = vadd.xlane.f32.xlu0 %v679_v31  ;;  %v436_v38 = vpop.f32.mrf.mxu0  ;;  %v682_v49 = vmul.f32 %v1403_v34, %v1403_v34 }
  0xf8   : > { %v629_v39 = vpop.f32.mrf.mxu1 }
  0xf9   : > { %v630_v40 = vadd.f32 %v629_v39, %v436_v38  ;;  %705 = vadd.xlane.f32.xlu1 %v680_v37  ;;  %v681_v41 = vmul.f32 %v1406_v35, %v1406_v35  ;;  %v1006_v43 = vpop.f32.mrf.mxu0  ;;  %v1413_v45 = vadd.f32 %v1352_v42, %v635_v36 }
  0xfa   : > { %v1038_v44 = vpop.f32.mrf.mxu1 }
  0xfb   : > { %v1416_v46 = vadd.f32 %v1352_v42, %v630_v40  ;;  %v645_v48 = vadd.f32 %v1038_v44, %v1006_v43  ;;  %707 = vadd.xlane.f32.xlu0 %v681_v41  ;;  %v446_v51 = vpop.f32.mrf.mxu0  ;;  %v684_v58 = vmul.f32 %v1413_v45, %v1413_v45 }
  0xfc   : > { %v639_v52 = vpop.f32.mrf.mxu1 }
  0xfd   : > { %v640_v53 = vadd.f32 %v639_v52, %v446_v51  ;;  %709 = vadd.xlane.f32.xlu1 %v682_v49  ;;  %v683_v54 = vmul.f32 %v1416_v46, %v1416_v46  ;;  %v1423_v55 = vadd.f32 %v1352_v42, %v645_v48 }
  0xff   : > { %v1426_v57 = vadd.f32 %v1352_v42, %v640_v53  ;;  %711 = vadd.xlane.f32.xlu0 %v683_v54  ;;  %v686_v61 = vmul.f32 %v1423_v55, %v1423_v55 }
 0x101   : > { %713 = vadd.xlane.f32.xlu1 %v684_v58  ;;  %v685_v60 = vmul.f32 %v1426_v57, %v1426_v57 }
 0x103   : > { %715 = vadd.xlane.f32.xlu0 %v685_v60 }
 0x105   : > { %717 = vadd.xlane.f32.xlu1 %v686_v61 }
 0x16e   : > { %v690_v62 = vpop.xlane.xlu0 %689 }
 0x16f   : > { %v720_v63 = vmax.f32 %v690_v62, 1e-24 }
 0x171   : > { %1080 = vrsqrt.f32 %v720_v63 }
 0x172   : > { %v694_v0 = vpop.xlane.xlu1 %693  ;;  %v688_v42 = vpop.xlane.xlu0 %687 }
 0x173   : > { %v722_v1 = vmax.f32 %v694_v0, 1e-24  ;;  %v719_v2 = vmax.f32 %v688_v42, 1e-24 }
 0x175   : > { %1082 = vrsqrt.f32 %v722_v1 }
 0x176   : > { %1084 = vrsqrt.f32 %v719_v2  ;;  %v692_v3 = vpop.xlane.xlu1 %691 }
 0x177   : > { %v721_v6 = vmax.f32 %v692_v3, 1e-24 }
 0x178   : > { %v696_v7 = vpop.xlane.xlu0 %695 }
 0x179   : > { %1086 = vrsqrt.f32 %v721_v6  ;;  %v723_v8 = vmax.f32 %v696_v7, 1e-24 }
 0x17a   : > { %v698_v9 = vpop.xlane.xlu1 %697 }
 0x17b   : > { %1088 = vrsqrt.f32 %v723_v8  ;;  %v724_v10 = vmax.f32 %v698_v9, 1e-24 }
 0x17c   : > { %v700_v11 = vpop.xlane.xlu0 %699 }
 0x17d   : > { %1090 = vrsqrt.f32 %v724_v10  ;;  %v725_v12 = vmax.f32 %v700_v11, 1e-24 }
 0x17e   : > { %v1081_v13 = vpop.eup %1080  ;;  %v702_v16 = vpop.xlane.xlu1 %701 }
 0x17f   : > { %v752_v17 = vmul.f32 %v1081_v13, %v1355_v47  ;;  %1092 = vrsqrt.f32 %v725_v12  ;;  %v726_v18 = vmax.f32 %v702_v16, 1e-24 }
 0x180   : > { %v704_v19 = vpop.xlane.xlu0 %703 }
 0x181   : > { %v768_v20 = vmax.f32 %v752_v17, 0.0  ;;  %1094 = vrsqrt.f32 %v726_v18  ;;  %v727_v21 = vmax.f32 %v704_v19, 1e-24 }
 0x182   : > { %v1083_v22 = vpop.eup %1082  ;;  %v706_v23 = vpop.xlane.xlu1 %705 }
 0x183   : > { %v1085_v26 = vpop.eup %1084  ;;  %784 = vst [vmem:[%s1438_s12 + $0x8] sm:$0xff] %v768_v20  ;;  %v754_v27 = vmul.f32 %v1083_v22, %v1363_v56  ;;  %1096 = vrsqrt.f32 %v727_v21  ;;  %v728_v28 = vmax.f32 %v706_v23, 1e-24 }
 0x184   : > { %v751_v47 = vmul.f32 %v1085_v26, %v1358_v50  ;;  %v708_v29 = vpop.xlane.xlu0 %707 }
 0x185   : > { %v770_v30 = vmax.f32 %v754_v27, 0.0  ;;  %1098 = vrsqrt.f32 %v728_v28  ;;  %v729_v31 = vmax.f32 %v708_v29, 1e-24 }
 0x186   : > { %v1087_v32 = vpop.eup %1086  ;;  %v767_v33 = vmax.f32 %v751_v47, 0.0  ;;  %v710_v36 = vpop.xlane.xlu1 %709 }
 0x187   : > { %786 = vst [vmem:[%s1438_s12 + $0x18] sm:$0xff] %v770_v30  ;;  %v753_v37 = vmul.f32 %v1087_v32, %v1366_v59  ;;  %1100 = vrsqrt.f32 %v729_v31  ;;  %v730_v38 = vmax.f32 %v710_v36, 1e-24 }
 0x188   : > { %v1089_v39 = vpop.eup %1088  ;;  %783 = vst [vmem:[%s1438_s12] sm:$0xff] %v767_v33  ;;  %v712_v56 = vpop.xlane.xlu0 %711 }
 0x189   : > { %v769_v40 = vmax.f32 %v753_v37, 0.0  ;;  %v755_v50 = vmul.f32 %v1089_v39, %v1376_v5  ;;  %1102 = vrsqrt.f32 %v730_v38  ;;  %v731_v41 = vmax.f32 %v712_v56, 1e-24 }
 0x18a   : > { %v1091_v43 = vpop.eup %1090  ;;  %v714_v44 = vpop.xlane.xlu1 %713 }
 0x18b   : > { %785 = vst [vmem:[%s1438_s12 + $0x10] sm:$0xff] %v769_v40  ;;  %v771_v48 = vmax.f32 %v755_v50, 0.0  ;;  %v756_v49 = vmul.f32 %v1091_v43, %v1373_v4  ;;  %1104 = vrsqrt.f32 %v731_v41  ;;  %v732_v59 = vmax.f32 %v714_v44, 1e-24 }
 0x18c   : > { %v1093_v51 = vpop.eup %1092  ;;  %v716_v52 = vpop.xlane.xlu0 %715 }
 0x18d   : > { %787 = vst [vmem:[%s1438_s12 + $0x20] sm:$0xff] %v771_v48  ;;  %v772_v53 = vmax.f32 %v756_v49, 0.0  ;;  %v757_v54 = vmul.f32 %v1093_v51, %v1386_v15  ;;  %1106 = vrsqrt.f32 %v732_v59  ;;  %v733_v5 = vmax.f32 %v716_v52, 1e-24 }
 0x18e   : > { %v1095_v58 = vpop.eup %1094  ;;  %v718_v60 = vpop.xlane.xlu1 %717 }
 0x18f   : > { %788 = vst [vmem:[%s1438_s12 + $0x28] sm:$0xff] %v772_v53  ;;  %v773_v61 = vmax.f32 %v757_v54, 0.0  ;;  %v758_v62 = vmul.f32 %v1095_v58, %v1383_v14  ;;  %1108 = vrsqrt.f32 %v733_v5  ;;  %v734_v4 = vmax.f32 %v718_v60, 1e-24 }
 0x190   : > { %v1097_v63 = vpop.eup %1096 }
 0x191   : > { %789 = vst [vmem:[%s1438_s12 + $0x30] sm:$0xff] %v773_v61  ;;  %v774_v0 = vmax.f32 %v758_v62, 0.0  ;;  %v759_v42 = vmul.f32 %v1097_v63, %v1396_v25  ;;  %1110 = vrsqrt.f32 %v734_v4 }
 0x192   : > { %v1099_v15 = vpop.eup %1098 }
 0x193   : > { %790 = vst [vmem:[%s1438_s12 + $0x38] sm:$0xff] %v774_v0  ;;  %v775_v1 = vmax.f32 %v759_v42, 0.0  ;;  %v760_v2 = vmul.f32 %v1099_v15, %v1393_v24 }
 0x194   : > { %v1101_v3 = vpop.eup %1100 }
 0x195   : > { %791 = vst [vmem:[%s1438_s12 + $0x40] sm:$0xff] %v775_v1  ;;  %v776_v14 = vmax.f32 %v760_v2, 0.0  ;;  %v761_v6 = vmul.f32 %v1101_v3, %v1406_v35 }
 0x196   : > { %v1103_v7 = vpop.eup %1102 }
 0x197   : > { %792 = vst [vmem:[%s1438_s12 + $0x48] sm:$0xff] %v776_v14  ;;  %v777_v8 = vmax.f32 %v761_v6, 0.0  ;;  %v762_v25 = vmul.f32 %v1103_v7, %v1403_v34 }
 0x198   : > { %v1105_v9 = vpop.eup %1104 }
 0x199   : > { %793 = vst [vmem:[%s1438_s12 + $0x50] sm:$0xff] %v777_v8  ;;  %v778_v10 = vmax.f32 %v762_v25, 0.0  ;;  %v763_v11 = vmul.f32 %v1105_v9, %v1416_v46 }
 0x19a   : > { %v1107_v24 = vpop.eup %1106 }
 0x19b   : > { %794 = vst [vmem:[%s1438_s12 + $0x58] sm:$0xff] %v778_v10  ;;  %v779_v12 = vmax.f32 %v763_v11, 0.0  ;;  %v764_v35 = vmul.f32 %v1107_v24, %v1413_v45 }
 0x19c   : > { %v1109_v13 = vpop.eup %1108 }
 0x19d   : > { %795 = vst [vmem:[%s1438_s12 + $0x60] sm:$0xff] %v779_v12  ;;  %v780_v16 = vmax.f32 %v764_v35, 0.0  ;;  %v765_v34 = vmul.f32 %v1109_v13, %v1426_v57 }
 0x19e   : > { %v1111_v17 = vpop.eup %1110 }
 0x19f   : > { %796 = vst [vmem:[%s1438_s12 + $0x68] sm:$0xff] %v780_v16  ;;  %v781_v18 = vmax.f32 %v765_v34, 0.0  ;;  %v766_v46 = vmul.f32 %v1111_v17, %v1423_v55 }
 0x1a1   : > { %797 = vst [vmem:[%s1438_s12 + $0x70] sm:$0xff] %v781_v18  ;;  %v782_v45 = vmax.f32 %v766_v46, 0.0 }
 0x1a3   : > { %798 = vst [vmem:[%s1438_s12 + $0x78] sm:$0xff] %v782_v45 }
 0x1a4   : > { %1125 = shalt.err (!%p1122_p3)
}
 0x1a5   : > { %s1126_s5 = scalar_lea.hbm %s1474_s23, 2048  ;;  %s1130_s7 = scalar_lea.hbm %s1526_s4, 4096 }
 0x1a6   : > { %p1127_p4 = scmp.ne.s32.totalorder %s1474_s23, %s1126_s5  ;;  %p1131_p9 = scmp.lt.s32.totalorder %s1474_s23, %s1526_s4 }
 0x1a7   : > { %p1132_p10 = scmp.lt.s32.totalorder %s1130_s7, %s1126_s5 }
 0x1a8   : > { %p1128_p7 = pnand %p1127_p4, %p1240_p5 }
 0x1a9   : > { %p1133_p11 = por %p1132_p10, %p1131_p9 }
 0x1aa   : > { %p1129_p8 = pneg %p1128_p7 }
 0x1ac   : > { %p1134_p12 = pnand %p1133_p11, %p1129_p8 }
 0x1ae   : > { %1137 = shalt.err (!%p1134_p12)
}
 0x1af   : > { %s1175_s11 = smov 128   ;;  %s1176_s12 = smov 8  }
 0x1b0   : > { %1039 = dma.vmem_to_hbm [thread:$0]  (%p1240_p5), %s1476_s14, 2048, %s1474_s23, %s1482_s19, %s1175_s11, %s1175_s11, %s1176_s12  }
 0x1b1 PF: > { %p1045_p13 = scmp.ge.s32.totalorder %s1172_s18, 2  ;;  %s828_s13 = sand.u32 1, %s1160_s15  }
 0x1b2   : > { %s829_s20 = scalar_lea.sflag [#allocation3], %s828_s13 }
 0x1b3   : > { %p1042_p0 = pnand %p1045_p13, %p1244_p6 }
 0x1b5   : > { %p1043_p1 = pneg %p1042_p0 }
 0x1b7   : > { %1155 = dma.done.wait (%p1043_p1), %s829_s20, 2048  }
 0x1b8   : > { %1157 = vsyncadd (%p1043_p1), %s829_s20, 4294965248  ;;  %p14_p2 = scmp.ge.s32.totalorder %s1227_s21, 4   ;;  %s1529_s15 = smov %s1164_s16 }
 0x1b9   : > { %s1530_s16 = smov %s1168_s17  ;;  %s1531_s17 = smov %s1238_s24 }
 0x1ba   : > { %s1532_s18 = smov %s1227_s21  ;;  %16 = sbr.rel (!%p14_p2) target bundleno = 3 (0x3), region = 74 }
 0x1bf   :  { %834 = vsyncpa [#allocation3], 1 }
 0x1c0   :  { %836 = vsyncpa [#allocation3 + $0x1], 1 }

</bundles_post_ra>
